<compile_context>
chip_gen: v5e
topology: v5e:2x2
jax: 0.10.0
libtpu: 0.0.40
codegen_flags: <defaults>
</compile_context>

<pallas_src>
import functools

import jax
import jax.numpy as jnp
from jax import lax
from jax.experimental import pallas as pl
from jax.experimental.pallas import tpu as pltpu

SOFTPLUS_EPS = 1e-6  # safe_softplus(x) = softplus(x) + eps (gpssm convention)
HIDDEN = 10


def _recognition_kernel(out_ref, in_ref, w1o_ref, w1i_ref, b1_ref,
                        wh_ref, bh_ref, y_ref):
    # out_ref: [TB, L*do]   in_ref: [TB, L*di]
    # w1o_ref: [L*do, 10]   w1i_ref: [L*di, 10]   b1_ref: [1, 10]
    # wh_ref : [10, 2*S]    bh_ref : [1, 2*S]     y_ref : [TB, 2*S]
    h = (jnp.dot(out_ref[...], w1o_ref[...], preferred_element_type=jnp.float32)
         + jnp.dot(in_ref[...], w1i_ref[...], preferred_element_type=jnp.float32)
         + b1_ref[...])
    h = jax.nn.sigmoid(h)  # EUP logistic

    # Fused heads: y = h @ [Wm | Wv] + [bm | bv]  -> single lane-dense output.
    y = jnp.dot(h, wh_ref[...], preferred_element_type=jnp.float32) + bh_ref[...]

    s = y_ref.shape[-1] // 2
    col = lax.broadcasted_iota(jnp.int32, y.shape, dimension=1)
    sp = jax.nn.softplus(y) + SOFTPLUS_EPS
    # First half: raw mean. Second half: safe_softplus(var pre-activation).
    y_ref[...] = jnp.where(col < s, y, sp).astype(y_ref.dtype)


@functools.partial(
    jax.jit,
    static_argnames=("length", "dim_outputs", "dim_inputs", "dim_states",
                     "num_particles"))
def nn_recognition_forward(output_sequence, input_sequence, params, *,
                           length, dim_outputs, dim_inputs, dim_states,
                           num_particles=1):
    """Pallas implementation of NNRecognition.forward.

    Returns (loc, cov_matrix):
      loc        : [B, dim_states, num_particles]
      cov_matrix : [B, dim_states, num_particles, num_particles] (diag_embed)
    """
    B = output_sequence.shape[0]
    L, do, di, S = length, dim_outputs, dim_inputs, dim_states

    # Glue (fused under this jit): truncate + flatten each stream separately;
    # the interleaved concat is absorbed into the W1 row split below.
    out_flat = output_sequence[:, :L, :].reshape(B, L * do).astype(jnp.float32)
    in_flat = input_sequence[:, :L, :].reshape(B, L * di).astype(jnp.float32)

    # Split W1 (stored in the original interleaved [o_t, i_t] feature layout)
    # so that out_flat @ W1o + in_flat @ W1i == x @ W1 with x = cat+flatten.
    w1 = params["w1"].reshape(L, do + di, HIDDEN)
    w1o = w1[:, :do, :].reshape(L * do, HIDDEN).astype(jnp.float32)
    w1i = w1[:, do:, :].reshape(L * di, HIDDEN).astype(jnp.float32)
    b1 = params["b1"].astype(jnp.float32)

    # Fused mean/var heads.
    wh = jnp.concatenate([params["wm"], params["wv"]], axis=1).astype(jnp.float32)
    bh = jnp.concatenate([params["bm"], params["bv"]], axis=1).astype(jnp.float32)

    # Batch tiling: whole batch when small; 512-row (multiple of 8, well under
    # v7x's 64 MiB VMEM even double-buffered) tiles when large, "parallel" so
    # the axis shards across TensorCores.
    TB = B if B <= 512 else 512
    grid = (pl.cdiv(B, TB),)

    def _full(shape):
        return pl.BlockSpec(shape, lambda i: (0, 0))

    y = pl.pallas_call(
        _recognition_kernel,
        out_shape=jax.ShapeDtypeStruct((B, 2 * S), jnp.float32),
        grid=grid,
        in_specs=[
            pl.BlockSpec((TB, L * do), lambda i: (i, 0)),
            pl.BlockSpec((TB, L * di), lambda i: (i, 0)),
            _full((L * do, HIDDEN)),
            _full((L * di, HIDDEN)),
            _full((1, HIDDEN)),
            _full((HIDDEN, 2 * S)),
            _full((1, 2 * S)),
        ],
        out_specs=pl.BlockSpec((TB, 2 * S), lambda i: (i, 0)),
        compiler_params=pltpu.CompilerParams(
            dimension_semantics=("parallel",)),
    )(out_flat, in_flat, w1o, w1i, b1, wh, bh)

    loc2d = y[:, :S]
    cov2d = y[:, S:]

    # expand(num_particles, B, S).permute(1, 2, 0) -> [B, S, P]
    loc = jnp.transpose(
        jnp.broadcast_to(loc2d[None], (num_particles, B, S)), (1, 2, 0))
    cov = jnp.transpose(
        jnp.broadcast_to(cov2d[None], (num_particles, B, S)), (1, 2, 0))
    # torch.diag_embed(cov): [B, S, P] -> [B, S, P, P]
    cov_matrix = cov[..., None] * jnp.eye(num_particles, dtype=cov.dtype)
    return loc, cov_matrix


def _reference_forward(output_sequence, input_sequence, params, *,
                       length, dim_states, num_particles):
    """Pure-JAX reference mirroring the PyTorch module, for correctness check."""
    B = output_sequence.shape[0]
    io = jnp.concatenate(
        (output_sequence[:, :length, :], input_sequence[:, :length, :]), axis=-1)
    x = io.reshape(B, -1).astype(jnp.float32)
    h = jax.nn.sigmoid(x @ params["w1"] + params["b1"])
    loc2d = h @ params["wm"] + params["bm"]
    cov2d = jax.nn.softplus(h @ params["wv"] + params["bv"]) + SOFTPLUS_EPS
    loc = jnp.transpose(
        jnp.broadcast_to(loc2d[None], (num_particles, B, dim_states)), (1, 2, 0))
    cov = jnp.transpose(
        jnp.broadcast_to(cov2d[None], (num_particles, B, dim_states)), (1, 2, 0))
    return loc, cov[..., None] * jnp.eye(num_particles, dtype=cov.dtype)


def init_params(key, dim_outputs, dim_inputs, dim_states, length, variance=1.0):
    """Deterministic synthetic init mirroring nn.Linear default shapes.

    Weights stored transposed (in_features, out_features) for row-major matmul.
    Biases stored as [1, out_features] for 2D TPU-friendly broadcasting.
    """
    F = length * (dim_inputs + dim_outputs)
    k1, k2, k3, k4, k5 = jax.random.split(key, 5)

    def uinit(k, fan_in, shape):
        bound = 1.0 / jnp.sqrt(jnp.float32(fan_in))
        return jax.random.uniform(k, shape, jnp.float32, -bound, bound)

    return {
        "w1": uinit(k1, F, (F, HIDDEN)),
        "b1": uinit(k2, F, (1, HIDDEN)),
        "wm": uinit(k3, HIDDEN, (HIDDEN, dim_states)),
        "bm": uinit(k4, HIDDEN, (1, dim_states)),
        "wv": uinit(k5, HIDDEN, (HIDDEN, dim_states)),
        # var.bias = ones * variance (per the module __init__)
        "bv": jnp.ones((1, dim_states), jnp.float32) * variance,
    }


if __name__ == "__main__":
    # Small, forward-consistent shapes.
    B = 2            # batch
    T = 8            # full sequence length in the data
    length = 4       # recognition length (truncation)
    dim_outputs = 3
    dim_inputs = 2
    dim_states = 4
    num_particles = 3
    variance = 1.0

    key = jax.random.PRNGKey(0)
    kp, ko, ki = jax.random.split(key, 3)

    params = init_params(kp, dim_outputs, dim_inputs, dim_states, length, variance)
    output_sequence = jax.random.normal(ko, (B, T, dim_outputs), jnp.float32)
    input_sequence = jax.random.normal(ki, (B, T, dim_inputs), jnp.float32)

    loc, cov_matrix = nn_recognition_forward(
        output_sequence, input_sequence, params,
        length=length, dim_outputs=dim_outputs, dim_inputs=dim_inputs,
        dim_states=dim_states, num_particles=num_particles)
    jax.block_until_ready((loc, cov_matrix))

    assert loc.shape == (B, dim_states, num_particles)
    assert cov_matrix.shape == (B, dim_states, num_particles, num_particles)

    # Numerical check against the pure-JAX reference of the PyTorch forward.
    ref_loc, ref_cov = _reference_forward(
        output_sequence, input_sequence, params,
        length=length, dim_states=dim_states, num_particles=num_particles)
    assert jnp.allclose(loc, ref_loc, atol=1e-5), "loc mismatch vs reference"
    assert jnp.allclose(cov_matrix, ref_cov, atol=1e-5), "cov mismatch vs reference"

    print("KERNEL_OK")
</pallas_src>

<mosaic_0001>
module attributes {stable_mosaic.version = 11 : i64} {
  func.func @_recognition_kernel(%arg0: i32, %arg1: memref<2x12xf32, #tpu.memory_space<vmem>>, %arg2: memref<2x8xf32, #tpu.memory_space<vmem>>, %arg3: memref<12x10xf32, #tpu.memory_space<vmem>>, %arg4: memref<8x10xf32, #tpu.memory_space<vmem>>, %arg5: memref<1x10xf32, #tpu.memory_space<vmem>>, %arg6: memref<10x8xf32, #tpu.memory_space<vmem>>, %arg7: memref<1x8xf32, #tpu.memory_space<vmem>>, %arg8: memref<2x8xf32, #tpu.memory_space<vmem>>) attributes {dimension_semantics = [#tpu.dimension_semantics<parallel>], iteration_bounds = array<i64: 1>, scalar_prefetch = 0 : i64, scratch_operands = 0 : i64, tpu.core_type = #tpu.core_type<tc>, window_params = [{transform_indices = @transform_0, window_bounds = array<i64: 2, 12>}, {transform_indices = @transform_1, window_bounds = array<i64: 2, 8>}, {pipeline_mode = #tpu.pipeline_mode<synchronous>, transform_indices = @transform_2, window_bounds = array<i64: 12, 10>}, {pipeline_mode = #tpu.pipeline_mode<synchronous>, transform_indices = @transform_3, window_bounds = array<i64: 8, 10>}, {pipeline_mode = #tpu.pipeline_mode<synchronous>, transform_indices = @transform_4, window_bounds = array<i64: 1, 10>}, {pipeline_mode = #tpu.pipeline_mode<synchronous>, transform_indices = @transform_5, window_bounds = array<i64: 10, 8>}, {pipeline_mode = #tpu.pipeline_mode<synchronous>, transform_indices = @transform_6, window_bounds = array<i64: 1, 8>}, {transform_indices = @transform_7, window_bounds = array<i64: 2, 8>}]} {
    %c0 = arith.constant 0 : index
    %c0_0 = arith.constant 0 : index
    %0 = vector.load %arg1[%c0, %c0_0] : memref<2x12xf32, #tpu.memory_space<vmem>>, vector<2x12xf32>
    %c0_1 = arith.constant 0 : index
    %c0_2 = arith.constant 0 : index
    %1 = vector.load %arg3[%c0_1, %c0_2] : memref<12x10xf32, #tpu.memory_space<vmem>>, vector<12x10xf32>
    %cst = arith.constant dense<0.000000e+00> : vector<2x10xf32>
    %2 = tpu.matmul %0, %1, %cst {dimension_numbers = #tpu.dot_dimension_numbers<[1], [0], [0], [1], [0, 0, 1, 1], [], []>} : vector<2x12xf32>, vector<12x10xf32>, vector<2x10xf32> -> vector<2x10xf32>
    %c0_3 = arith.constant 0 : index
    %c0_4 = arith.constant 0 : index
    %3 = vector.load %arg2[%c0_3, %c0_4] : memref<2x8xf32, #tpu.memory_space<vmem>>, vector<2x8xf32>
    %c0_5 = arith.constant 0 : index
    %c0_6 = arith.constant 0 : index
    %4 = vector.load %arg4[%c0_5, %c0_6] : memref<8x10xf32, #tpu.memory_space<vmem>>, vector<8x10xf32>
    %cst_7 = arith.constant dense<0.000000e+00> : vector<2x10xf32>
    %5 = tpu.matmul %3, %4, %cst_7 {dimension_numbers = #tpu.dot_dimension_numbers<[1], [0], [0], [1], [0, 0, 1, 1], [], []>} : vector<2x8xf32>, vector<8x10xf32>, vector<2x10xf32> -> vector<2x10xf32>
    %6 = arith.addf %2, %5 : vector<2x10xf32>
    %c0_8 = arith.constant 0 : index
    %c0_9 = arith.constant 0 : index
    %7 = vector.load %arg5[%c0_8, %c0_9] : memref<1x10xf32, #tpu.memory_space<vmem>>, vector<1x10xf32>
    %8 = vector.broadcast %7 : vector<1x10xf32> to vector<2x10xf32>
    %9 = arith.addf %6, %8 : vector<2x10xf32>
    %10 = arith.negf %9 : vector<2x10xf32>
    %11 = math.exp %10 : vector<2x10xf32>
    %cst_10 = arith.constant 1.000000e+00 : f32
    %12 = vector.broadcast %cst_10 : f32 to vector<2x10xf32>
    %13 = arith.addf %12, %11 : vector<2x10xf32>
    %14 = arith.divf %12, %13 : vector<2x10xf32>
    %c0_11 = arith.constant 0 : index
    %c0_12 = arith.constant 0 : index
    %15 = vector.load %arg6[%c0_11, %c0_12] : memref<10x8xf32, #tpu.memory_space<vmem>>, vector<10x8xf32>
    %cst_13 = arith.constant dense<0.000000e+00> : vector<2x8xf32>
    %16 = tpu.matmul %14, %15, %cst_13 {dimension_numbers = #tpu.dot_dimension_numbers<[1], [0], [0], [1], [0, 0, 1, 1], [], []>} : vector<2x10xf32>, vector<10x8xf32>, vector<2x8xf32> -> vector<2x8xf32>
    %c0_14 = arith.constant 0 : index
    %c0_15 = arith.constant 0 : index
    %17 = vector.load %arg7[%c0_14, %c0_15] : memref<1x8xf32, #tpu.memory_space<vmem>>, vector<1x8xf32>
    %18 = vector.broadcast %17 : vector<1x8xf32> to vector<2x8xf32>
    %19 = arith.addf %16, %18 : vector<2x8xf32>
    %20 = tpu.iota {dimensions = array<i32: 1>} : vector<2x8xi32>
    %cst_16 = arith.constant 0.000000e+00 : f32
    %21 = vector.broadcast %cst_16 : f32 to vector<2x8xf32>
    %22 = arith.maximumf %19, %21 : vector<2x8xf32>
    %23 = vector.broadcast %cst_16 : f32 to vector<2x8xf32>
    %24 = arith.subf %19, %23 : vector<2x8xf32>
    %25 = arith.cmpf one, %24, %24 : vector<2x8xf32>
    %26 = vector.broadcast %cst_16 : f32 to vector<2x8xf32>
    %27 = arith.addf %19, %26 : vector<2x8xf32>
    %28 = math.absf %24 : vector<2x8xf32>
    %cst_17 = arith.constant 0.000000e+00 : f32
    %29 = vector.broadcast %cst_17 : f32 to vector<2x8xf32>
    %30 = arith.subf %29, %28 : vector<2x8xf32>
    %31 = math.exp %30 : vector<2x8xf32>
    %32 = math.log1p %31 : vector<2x8xf32>
    %33 = arith.addf %22, %32 : vector<2x8xf32>
    %34 = arith.select %25, %27, %33 : vector<2x8xi1>, vector<2x8xf32>
    %cst_18 = arith.constant 9.99999997E-7 : f32
    %35 = vector.broadcast %cst_18 : f32 to vector<2x8xf32>
    %36 = arith.addf %34, %35 : vector<2x8xf32>
    %c4_i32 = arith.constant 4 : i32
    %37 = vector.broadcast %c4_i32 : i32 to vector<2x8xi32>
    %38 = arith.cmpi slt, %20, %37 : vector<2x8xi32>
    %39 = arith.select %38, %19, %36 : vector<2x8xi1>, vector<2x8xf32>
    %c0_19 = arith.constant 0 : index
    %c0_20 = arith.constant 0 : index
    %40 = vector.load %arg8[%c0_19, %c0_20] : memref<2x8xf32, #tpu.memory_space<vmem>>, vector<2x8xf32>
    tpu.vector_store %arg8[%c0_19, %c0_20], %39 {strides = array<i32>} : memref<2x8xf32, #tpu.memory_space<vmem>>, vector<2x8xf32>,
    return
  }
  func.func @transform_0(%arg0: i32) -> (i32, i32) {
    %c0_i32 = arith.constant 0 : i32
    %c0_i32_0 = arith.constant 0 : i32
    return %arg0, %c0_i32 : i32, i32
  }
  func.func @transform_1(%arg0: i32) -> (i32, i32) {
    %c0_i32 = arith.constant 0 : i32
    %c0_i32_0 = arith.constant 0 : i32
    return %arg0, %c0_i32 : i32, i32
  }
  func.func @transform_2(%arg0: i32) -> (i32, i32) {
    %c0_i32 = arith.constant 0 : i32
    %c0_i32_0 = arith.constant 0 : i32
    %c0_i32_1 = arith.constant 0 : i32
    return %c0_i32, %c0_i32_0 : i32, i32
  }
  func.func @transform_3(%arg0: i32) -> (i32, i32) {
    %c0_i32 = arith.constant 0 : i32
    %c0_i32_0 = arith.constant 0 : i32
    %c0_i32_1 = arith.constant 0 : i32
    return %c0_i32, %c0_i32_0 : i32, i32
  }
  func.func @transform_4(%arg0: i32) -> (i32, i32) {
    %c0_i32 = arith.constant 0 : i32
    %c0_i32_0 = arith.constant 0 : i32
    %c0_i32_1 = arith.constant 0 : i32
    return %c0_i32, %c0_i32_0 : i32, i32
  }
  func.func @transform_5(%arg0: i32) -> (i32, i32) {
    %c0_i32 = arith.constant 0 : i32
    %c0_i32_0 = arith.constant 0 : i32
    %c0_i32_1 = arith.constant 0 : i32
    return %c0_i32, %c0_i32_0 : i32, i32
  }
  func.func @transform_6(%arg0: i32) -> (i32, i32) {
    %c0_i32 = arith.constant 0 : i32
    %c0_i32_0 = arith.constant 0 : i32
    %c0_i32_1 = arith.constant 0 : i32
    return %c0_i32, %c0_i32_0 : i32, i32
  }
  func.func @transform_7(%arg0: i32) -> (i32, i32) {
    %c0_i32 = arith.constant 0 : i32
    %c0_i32_0 = arith.constant 0 : i32
    return %arg0, %c0_i32 : i32, i32
  }
}

</mosaic_0001>

<bundles_post_ra>
// kernel: nn_recognition_forward.1
= control target key start
LH: loop header
LB: loop body
LE: loop exit
PB: predicated region body
PF: predicated region fallthrough
CT: control target
= control target key end

     0   :  { %vm59_vm0 = vcmask 1043456   ;;  %vm31_vm1 = vcmask 64512   ;;  %vm55_vm2 = vcmask 97280   ;;  %vm117_vm3 = vcmask 1041408   ;;  %s256_s2 = inlined_call_operand.vmem [shape: f32[12,10], index: 2, kind: input, shape index: {}]   ;;  %s257_s3 = inlined_call_operand.vmem [shape: f32[8,10], index: 3, kind: input, shape index: {}]   ;;  %s258_s1 = inlined_call_operand.vmem [shape: f32[2,8], index: 1, kind: input, shape index: {}]   ;;  %s259_s0 = inlined_call_operand.vmem [shape: f32[2,12], index: 0, kind: input, shape index: {}]   ;;  %s260_s4 = inlined_call_operand.vmem [shape: f32[1,10], index: 4, kind: input, shape index: {}]   ;;  %s261_s6 = inlined_call_operand.vmem [shape: f32[1,8], index: 6, kind: input, shape index: {}]   ;;  %s262_s5 = inlined_call_operand.vmem [shape: f32[10,8], index: 5, kind: input, shape index: {}]   ;;  %s263_s7 = inlined_call_operand.vmem [shape: f32[2,8], index: 7, kind: output, shape index: {}]  }
   0x1   :  { %v28_v0 = vld [vmem:[%s256_s2 + $0x8] sm:$0xf]  ;;  %v30_v1 = vld [vmem:[%s257_s3] sm:$0xff]  ;;  %vm113_vm7 = vcmask 80896   ;;  %v141_v35 = vlaneseq  ;;  %vm164_vm12 = vcmask 58368  }
   0x2   :  { %v27_v2 = vld [vmem:[%s256_s2] sm:$0xff]  ;;  %171 = vmatpush.msk.msra.mxu1 %vm59_vm0, %v28_v0  ;;  %50 = vmatpush.msra.mxu0 %v30_v1  ;;  %v108_v5 = vld [vmem:[%s262_s5 + $0x8] sm:$0x3] }
   0x3   :  { %v29_v3 = vld [vmem:[%s258_s1] sm:$0x3]  ;;  %174 = vmatpush.msk.msra.mxu2 %vm117_vm3, %v108_v5  ;;  %v142_v40 = vand.u32 127, %v141_v35 }
   0x4   :  { %v26_v4 = vld [vmem:[%s259_s0] sm:$0x3]  ;;  %170 = vmatmul.msk.f32.vlgmr.msra.gmra.mxu0 %vm31_vm1, %v29_v3  ;;  %78 = vmatpush.msra.mxu1 %v27_v2 }
   0x5   :  { %172 = vmatmul.msk.f32.vlgmr.msra.gmra.mxu1 %vm55_vm2, %v26_v4  ;;  %v107_v6 = vld [vmem:[%s262_s5] sm:$0xff]  ;;  %vm162_vm11 = vcmp.lt.s32.totalorder %v142_v40, 4 }
   0x6   :  { %136 = vmatpush.msra.mxu2 %v107_v6  ;;  %v176_v8 = vld [vmem:[%s260_s4] ss:$0 sm:$0xff] }
   0x7   :  { %v177_v25 = vld [vmem:[%s261_s6] ss:$0 sm:$0xff] }
  0x81   :  { %v52_v7 = vpop.f32.mrf.mxu0 }
  0x82   :  { %v80_v9 = vpop.f32.mrf.mxu1 }
  0x83   :  { %v81_v10 = vadd.f32 %v80_v9, %v52_v7 }
  0x85   :  { %v87_v11 = vadd.f32 %v176_v8, %v81_v10 }
  0x87   :  { %v173_v12 = vmul.f32 -1.442695, %v87_v11 }
  0x89   :  { %178 = vpow2.f32 %v173_v12 }
  0x8f   :  { %v179_v13 = vpop.eup %178 }
  0x90   :  { %v91_v14 = vadd.f32 1.0, %v179_v13 }
  0x92   :  { %180 = vrcp.f32 %v91_v14  ;;  %v103_v18 = vand.u32 2147483648, %v91_v14  ;;  %v101_v20 = vand.u32 2147483647, %v91_v14  ;;  %vm97_vm5 = vweird.f32 %v91_v14 }
  0x94   :  { %v104_v22 = vor.u32 1.1754944e-38, %v103_v18  ;;  %vm102_vm8 = vcmp.eq.f32.partialorder %v101_v20, 8.507059e+37 }
  0x98   :  { %v181_v15 = vpop.eup %180 }
  0x99   :  { %v93_v16 = vmul.f32 %v181_v15, %v91_v14  ;;  %vm98_vm4 = vweird.f32 %v181_v15 }
  0x9a   :  { %vm99_vm6 = vmor %vm97_vm5, %vm98_vm4 }
  0x9b   :  { %v94_v17 = vsub.f32 1.0, %v93_v16 }
  0x9d   :  { %v95_v19 = vmul.f32 %v181_v15, %v94_v17 }
  0x9f   :  { %v96_v21 = vadd.f32 %v181_v15, %v95_v19 }
  0xa1   :  { %v100_v23 = vsel %vm99_vm6, %v181_v15, %v96_v21 }
  0xa2   :  { %v105_v24 = vsel %vm102_vm8, %v104_v22, %v100_v23 }
  0xa3   :  { %175 = vmatmul.msk.f32.vlgmr.msra.gmra.mxu2 %vm113_vm7, %v105_v24 }
 0x126   :  { %v138_v26 = vpop.f32.mrf.mxu2 }
 0x127   :  { %v139_v27 = vadd.f32 %v177_v25, %v138_v26 }
 0x129   :  { %v146_v28 = vand.u32 2147483647, %v139_v27  ;;  %v143_v41 = vmax.f32 %v139_v27, 0.0  ;;  %vm144_vm10 = vcmp.ne.f32.partialorder %v139_v27, %v139_v27 }
 0x12b   :  { %v147_v29 = vsub.f32 0.0, %v146_v28 }
 0x12d   :  { %v148_v30 = vmul.f32 1.442695, %v147_v29 }
 0x12f   :  { %182 = vpow2.f32 %v148_v30 }
 0x135   :  { %v183_v31 = vpop.eup %182 }
 0x136   :  { %v150_v32 = vadd.f32 1.0, %v183_v31  ;;  %v153_v33 = vmul.f32 -0.5, %v183_v31  ;;  %v156_v36 = vand.u32 2147483647, %v183_v31 }
 0x138   :  { %184 = vlog2.f32 %v150_v32  ;;  %v154_v34 = vadd.f32 1.0, %v153_v33  ;;  %vm157_vm9 = vcmp.lt.f32.partialorder %v156_v36, 0.0004427343 }
 0x13a   :  { %v155_v39 = vmul.f32 %v183_v31, %v154_v34 }
 0x13e   :  { %v185_v37 = vpop.eup %184 }
 0x13f   :  { %v152_v38 = vmul.f32 0.6931472, %v185_v37 }
 0x141   :  { %v158_v42 = vsel %vm157_vm9, %v155_v39, %v152_v38 }
 0x142   :  { %v159_v43 = vadd.f32 %v158_v42, %v143_v41 }
 0x144   :  { %v160_v44 = vsel %vm144_vm10, %v139_v27, %v159_v43 }
 0x145   :  { %v161_v45 = vadd.f32 1e-06, %v160_v44 }
 0x147   :  { %v163_v46 = vsel %vm162_vm11, %v139_v27, %v161_v45 }
 0x148   :  { %165 = vst.msk [vmem:[%s263_s7] sm:$0x3] %vm164_vm12, %v163_v46 }

</bundles_post_ra>
